<compile_context>
chip_gen: v7x
topology: tpu7x:2x2x1
jax: 0.10.0
libtpu: 0.0.40
codegen_flags: <defaults>
</compile_context>

<pallas_src>
import functools

import jax
import jax.numpy as jnp
from jax import lax
from jax.experimental import pallas as pl
from jax.experimental.pallas import tpu as pltpu


_VMEM_LIMIT = 64 * 1024 * 1024  # TODO(synk): tune per generation (v5e/v6e can go higher).


def _pick_row_tile(n, target=256):
    """Largest row tile <= target that divides n and is a multiple of 8 (else n)."""
    if n <= target:
        return n
    for t in range(target - target % 8, 7, -8):
        if n % t == 0:
            return t
    return n


# --------------------------- Pallas kernels -------------------------------- #

def _graph_cnn_fused_kernel(a_ref, v_ref, waT_ref, wiT_ref, ba_ref,
                            y_ref, s_ref, sq_ref, u_ref,
                            *, no_A, n_nodes, tile_n, apply_relu):
    # a_ref  : (TN, L*N)  row tile of A viewed as (B, N, L*N)  (no wrapper transpose)
    # v_ref  : (N, F)     all nodes of the current batch element (resident across row tiles)
    # waT_ref: (L, F, C)  per-slice Wa_l^T ;  wiT_ref: (F, C) ;  ba_ref: (1, C)
    # y_ref  : (TN, C)    output tile
    # s_ref / sq_ref: (1, C) per-batch BN partial sums, accumulated across row tiles
    # u_ref  : (L*N, C)   VMEM scratch  U = stack_l(V @ Wa_l^T), built once per batch
    i = pl.program_id(1)

    @pl.when(i == 0)
    def _():
        v = v_ref[...]
        for l in range(no_A):  # no_A is tiny -> static unroll
            u_l = jnp.dot(v, waT_ref[l], preferred_element_type=jnp.float32)
            u_ref[pl.ds(l * n_nodes, n_nodes), :] = u_l.astype(u_ref.dtype)
        s_ref[...] = jnp.zeros_like(s_ref)
        sq_ref[...] = jnp.zeros_like(sq_ref)

    # sum_l (A_l @ V) @ Wa_l^T  ==  A_tile(TN, L*N) @ U(L*N, C): one MXU call.
    acc = jnp.dot(a_ref[...].astype(u_ref.dtype), u_ref[...],
                  preferred_element_type=jnp.float32)

    # lin_I on the same row tile of V (sliced out of the resident full-V block).
    if tile_n == n_nodes:
        v_tile = v_ref[...]
    else:
        start = pl.multiple_of(i * tile_n, tile_n)
        v_tile = v_ref[pl.ds(start, tile_n), :]
    acc = acc + jnp.dot(v_tile, wiT_ref[...], preferred_element_type=jnp.float32)
    acc = acc + ba_ref[...]
    if apply_relu:
        acc = jnp.maximum(acc, 0.0)
    y_ref[...] = acc

    # BN partial statistics: channels on lanes, reduce over sublanes only.
    s_ref[...] += jnp.sum(acc, axis=0, keepdims=True)
    sq_ref[...] += jnp.sum(acc * acc, axis=0, keepdims=True)


def _bn_apply_kernel(y_ref, scale_ref, shift_ref, o_ref):
    # Pure per-channel FMA; scale/shift precomputed from the global stats.
    o_ref[...] = y_ref[...] * scale_ref[...] + shift_ref[...]


# --------------------------- Module forward -------------------------------- #

def graph_cnn_layer_forward(A, V, params, is_relu=True, is_bn=True, eps=1e-5,
                            a_dtype=jnp.bfloat16, row_tile=None):
    """Mirrors GraphCNNLayer.forward (fresh module, training-mode BatchNorm)."""
    B, N, L, _ = A.shape
    F_ = V.shape[-1]
    C = params["Wa"].shape[0]
    LN = L * N

    tile_n = row_tile or _pick_row_tile(N)
    n_tiles = N // tile_n

    # A in its original layout is already contiguous as (B, N, L*N): pure view.
    A_flat = A.reshape(B, N, LN).astype(a_dtype)
    Vf = V.astype(jnp.float32)
    waT = jnp.transpose(params["Wa"]).reshape(L, F_, C)   # (C, L*F) -> (L, F, C) = Wa_l^T
    wiT = jnp.transpose(params["Wi"]).astype(jnp.float32)  # (F, C)
    ba = params["ba"].reshape(1, C).astype(jnp.float32)

    kernel1 = functools.partial(_graph_cnn_fused_kernel, no_A=L, n_nodes=N,
                                tile_n=tile_n, apply_relu=is_relu)
    y, s, sq = pl.pallas_call(
        kernel1,
        out_shape=(jax.ShapeDtypeStruct((B, N, C), jnp.float32),
                   jax.ShapeDtypeStruct((B, 1, C), jnp.float32),
                   jax.ShapeDtypeStruct((B, 1, C), jnp.float32)),
        grid=(B, n_tiles),
        in_specs=[
            pl.BlockSpec((None, tile_n, LN), lambda b, i: (b, i, 0)),
            pl.BlockSpec((None, N, F_), lambda b, i: (b, 0, 0)),    # resident per batch
            pl.BlockSpec((L, F_, C), lambda b, i: (0, 0, 0)),       # weights stay resident
            pl.BlockSpec((F_, C), lambda b, i: (0, 0)),
            pl.BlockSpec((1, C), lambda b, i: (0, 0)),
        ],
        out_specs=(
            pl.BlockSpec((None, tile_n, C), lambda b, i: (b, i, 0)),
            pl.BlockSpec((None, 1, C), lambda b, i: (b, 0, 0)),     # accumulated over i
            pl.BlockSpec((None, 1, C), lambda b, i: (b, 0, 0)),
        ),
        scratch_shapes=[pltpu.VMEM((LN, C), a_dtype)],
        compiler_params=pltpu.CompilerParams(
            dimension_semantics=("parallel", "arbitrary"),
            vmem_limit_bytes=_VMEM_LIMIT),
    )(A_flat, Vf, waT, wiT, ba)

    if not is_bn:
        return y

    # Fold the tiny (B,1,C) partial stats into per-channel scale/shift once.
    # TODO(synk): training-mode batch statistics; eval mode would use running stats.
    count = float(B * N)
    s_tot = jnp.sum(s, axis=0)                              # (1, C)
    sq_tot = jnp.sum(sq, axis=0)                            # (1, C)
    mean = s_tot / count
    var = jnp.maximum(sq_tot / count - mean * mean, 0.0)    # clamp cancellation
    inv = lax.rsqrt(var + eps)
    scale = params["gamma"].reshape(1, C).astype(jnp.float32) * inv
    shift = params["beta"].reshape(1, C).astype(jnp.float32) - mean * scale

    return pl.pallas_call(
        _bn_apply_kernel,
        out_shape=jax.ShapeDtypeStruct((B, N, C), jnp.float32),
        grid=(B, n_tiles),
        in_specs=[
            pl.BlockSpec((None, tile_n, C), lambda b, i: (b, i, 0)),
            pl.BlockSpec((1, C), lambda b, i: (0, 0)),
            pl.BlockSpec((1, C), lambda b, i: (0, 0)),
        ],
        out_specs=pl.BlockSpec((None, tile_n, C), lambda b, i: (b, i, 0)),
        input_output_aliases={0: 0},   # reuse y's HBM buffer for the BN output
        compiler_params=pltpu.CompilerParams(
            dimension_semantics=("parallel", "parallel"),
            vmem_limit_bytes=_VMEM_LIMIT),
    )(y, scale, shift)


# ------------------------------ Reference ----------------------------------- #

def _reference(A, V, params, is_relu=True, is_bn=True, eps=1e-5):
    B, N, L, _ = A.shape
    F_ = V.shape[-1]
    A_r = A.reshape(B, N * L, N).astype(jnp.float32)
    n = jnp.matmul(A_r, V.astype(jnp.float32))            # (B, N*L, F)
    n = n.reshape(B, N, L * F_)
    y = n @ params["Wa"].T + params["ba"] + V @ params["Wi"].T
    if is_relu:
        y = jnp.maximum(y, 0.0)
    if is_bn:
        x = jnp.transpose(y, (0, 2, 1))                   # (B, C, N)
        mean = jnp.mean(x, axis=(0, 2), keepdims=True)
        var = jnp.mean((x - mean) ** 2, axis=(0, 2), keepdims=True)
        x = (x - mean) * lax.rsqrt(var + eps)
        x = x * params["gamma"].reshape(1, -1, 1) + params["beta"].reshape(1, -1, 1)
        y = jnp.transpose(x, (0, 2, 1))
    return y


# --------------------------------- Main ------------------------------------- #

if __name__ == "__main__":
    B = 2
    nodes = 8               # N
    no_A = 2                # L
    input_features_V = 16   # F
    output_features_V = 8   # C

    key = jax.random.PRNGKey(0)
    kA, kV, kwa, kwi, kg, kb = jax.random.split(key, 6)

    std = 1.0 / (input_features_V * (no_A + 1)) ** 0.5
    params = {
        "Wa": std * jax.random.normal(kwa, (output_features_V, input_features_V * no_A), jnp.float32),
        "ba": jnp.full((output_features_V,), 0.1, jnp.float32),
        "Wi": std * jax.random.normal(kwi, (output_features_V, input_features_V), jnp.float32),
        "gamma": 1.0 + 0.1 * jax.random.normal(kg, (output_features_V,), jnp.float32),
        "beta": 0.1 * jax.random.normal(kb, (output_features_V,), jnp.float32),
    }

    # A: (B, N, no_A, N); V: (B, N, F)
    A = jax.random.normal(kA, (B, nodes, no_A, nodes), jnp.float32)
    V = jax.random.normal(kV, (B, nodes, input_features_V), jnp.float32)

    ref = _reference(A, V, params, is_relu=True, is_bn=True)

    # f32 path: tight check of the fused-kernel math (reordered lin_A, BN fold).
    fwd_f32 = jax.jit(lambda a, v, p: graph_cnn_layer_forward(a, v, p, a_dtype=jnp.float32))
    out_f32 = fwd_f32(A, V, params)
    jax.block_until_ready(out_f32)
    assert out_f32.shape == (B, nodes, output_features_V), out_f32.shape
    assert jnp.allclose(out_f32, ref, atol=1e-4, rtol=1e-4), float(jnp.max(jnp.abs(out_f32 - ref)))

    # bf16-A fast path (half HBM traffic on the dominant tensor): looser tolerance.
    fwd_bf16 = jax.jit(lambda a, v, p: graph_cnn_layer_forward(a, v, p, a_dtype=jnp.bfloat16))
    out_bf16 = fwd_bf16(A, V, params)
    jax.block_until_ready(out_bf16)
    assert out_bf16.shape == (B, nodes, output_features_V), out_bf16.shape
    assert jnp.allclose(out_bf16, ref, atol=8e-2, rtol=8e-2), float(jnp.max(jnp.abs(out_bf16 - ref)))

    print("KERNEL_OK")
</pallas_src>

<mosaic_0001>
module attributes {stable_mosaic.version = 11 : i64} {
  func.func @_graph_cnn_fused_kernel(%arg0: i32, %arg1: i32, %arg2: memref<1x8x16xf32, #tpu.memory_space<vmem>>, %arg3: memref<1x8x16xf32, #tpu.memory_space<vmem>>, %arg4: memref<2x16x8xf32, #tpu.memory_space<vmem>>, %arg5: memref<16x8xf32, #tpu.memory_space<vmem>>, %arg6: memref<1x8xf32, #tpu.memory_space<vmem>>, %arg7: memref<1x8x8xf32, #tpu.memory_space<vmem>>, %arg8: memref<1x1x8xf32, #tpu.memory_space<vmem>>, %arg9: memref<1x1x8xf32, #tpu.memory_space<vmem>>, %arg10: memref<16x8xf32, #tpu.memory_space<vmem>>) attributes {dimension_semantics = [#tpu.dimension_semantics<parallel>, #tpu.dimension_semantics<arbitrary>], iteration_bounds = array<i64: 2, 1>, scalar_prefetch = 0 : i64, scratch_operands = 1 : i64, tpu.core_type = #tpu.core_type<tc>, window_params = [{transform_indices = @transform_0, window_bounds = array<i64: 1, 8, 16>}, {transform_indices = @transform_1, window_bounds = array<i64: 1, 8, 16>}, {pipeline_mode = #tpu.pipeline_mode<synchronous>, transform_indices = @transform_2, window_bounds = array<i64: 2, 16, 8>}, {pipeline_mode = #tpu.pipeline_mode<synchronous>, transform_indices = @transform_3, window_bounds = array<i64: 16, 8>}, {pipeline_mode = #tpu.pipeline_mode<synchronous>, transform_indices = @transform_4, window_bounds = array<i64: 1, 8>}, {transform_indices = @transform_5, window_bounds = array<i64: 1, 8, 8>}, {transform_indices = @transform_6, window_bounds = array<i64: 1, 1, 8>}, {transform_indices = @transform_7, window_bounds = array<i64: 1, 1, 8>}]} {
    %c0_i32 = arith.constant 0 : i32
    %0 = arith.cmpi eq, %arg1, %c0_i32 : i32
    %1 = arith.extui %0 : i1 to i32
    %c0_i32_0 = arith.constant 0 : i32
    %2 = arith.cmpi ne, %1, %c0_i32_0 : i32
    scf.if %2 {
      %c0_31 = arith.constant 0 : index
      %c0_32 = arith.constant 0 : index
      %c0_33 = arith.constant 0 : index
      %37 = vector.load %arg3[%c0_31, %c0_32, %c0_33] : memref<1x8x16xf32, #tpu.memory_space<vmem>>, vector<1x8x16xf32>
      %38 = vector.shape_cast %37 : vector<1x8x16xf32> to vector<8x16xf32>
      %c0_34 = arith.constant 0 : index
      %c0_35 = arith.constant 0 : index
      %c0_36 = arith.constant 0 : index
      %39 = vector.load %arg4[%c0_34, %c0_35, %c0_36] : memref<2x16x8xf32, #tpu.memory_space<vmem>>, vector<1x16x8xf32>
      %40 = vector.shape_cast %39 : vector<1x16x8xf32> to vector<16x8xf32>
      %cst_37 = arith.constant dense<0.000000e+00> : vector<8x8xf32>
      %41 = tpu.matmul %38, %40, %cst_37 {dimension_numbers = #tpu.dot_dimension_numbers<[1], [0], [0], [1], [0, 0, 1, 1], [], []>} : vector<8x16xf32>, vector<16x8xf32>, vector<8x8xf32> -> vector<8x8xf32>
      %c0_38 = arith.constant 0 : index
      %c0_39 = arith.constant 0 : index
      %42 = vector.load %arg10[%c0_38, %c0_39] : memref<16x8xf32, #tpu.memory_space<vmem>>, vector<8x8xf32>
      tpu.vector_store %arg10[%c0_38, %c0_39], %41 {strides = array<i32>} : memref<16x8xf32, #tpu.memory_space<vmem>>, vector<8x8xf32>,
      %c1 = arith.constant 1 : index
      %c0_40 = arith.constant 0 : index
      %c0_41 = arith.constant 0 : index
      %43 = vector.load %arg4[%c1, %c0_40, %c0_41] : memref<2x16x8xf32, #tpu.memory_space<vmem>>, vector<1x16x8xf32>
      %44 = vector.shape_cast %43 : vector<1x16x8xf32> to vector<16x8xf32>
      %cst_42 = arith.constant dense<0.000000e+00> : vector<8x8xf32>
      %45 = tpu.matmul %38, %44, %cst_42 {dimension_numbers = #tpu.dot_dimension_numbers<[1], [0], [0], [1], [0, 0, 1, 1], [], []>} : vector<8x16xf32>, vector<16x8xf32>, vector<8x8xf32> -> vector<8x8xf32>
      %c8 = arith.constant 8 : index
      %c0_43 = arith.constant 0 : index
      %46 = vector.load %arg10[%c8, %c0_43] : memref<16x8xf32, #tpu.memory_space<vmem>>, vector<8x8xf32>
      tpu.vector_store %arg10[%c8, %c0_43], %45 {strides = array<i32>} : memref<16x8xf32, #tpu.memory_space<vmem>>, vector<8x8xf32>,
      %cst_44 = arith.constant 0.000000e+00 : f32
      %47 = vector.broadcast %cst_44 : f32 to vector<1x8xf32>
      %c0_45 = arith.constant 0 : index
      %c0_46 = arith.constant 0 : index
      %c0_47 = arith.constant 0 : index
      %48 = vector.load %arg8[%c0_45, %c0_46, %c0_47] : memref<1x1x8xf32, #tpu.memory_space<vmem>>, vector<1x1x8xf32>
      %49 = vector.shape_cast %48 : vector<1x1x8xf32> to vector<1x8xf32>
      %50 = vector.shape_cast %47 : vector<1x8xf32> to vector<1x1x8xf32>
      tpu.vector_store %arg8[%c0_45, %c0_46, %c0_47], %50 {strides = array<i32>} : memref<1x1x8xf32, #tpu.memory_space<vmem>>, vector<1x1x8xf32>,
      %cst_48 = arith.constant 0.000000e+00 : f32
      %51 = vector.broadcast %cst_48 : f32 to vector<1x8xf32>
      %c0_49 = arith.constant 0 : index
      %c0_50 = arith.constant 0 : index
      %c0_51 = arith.constant 0 : index
      %52 = vector.load %arg9[%c0_49, %c0_50, %c0_51] : memref<1x1x8xf32, #tpu.memory_space<vmem>>, vector<1x1x8xf32>
      %53 = vector.shape_cast %52 : vector<1x1x8xf32> to vector<1x8xf32>
      %54 = vector.shape_cast %51 : vector<1x8xf32> to vector<1x1x8xf32>
      tpu.vector_store %arg9[%c0_49, %c0_50, %c0_51], %54 {strides = array<i32>} : memref<1x1x8xf32, #tpu.memory_space<vmem>>, vector<1x1x8xf32>,
    } else {
    }
    %c0 = arith.constant 0 : index
    %c0_1 = arith.constant 0 : index
    %c0_2 = arith.constant 0 : index
    %3 = vector.load %arg2[%c0, %c0_1, %c0_2] : memref<1x8x16xf32, #tpu.memory_space<vmem>>, vector<1x8x16xf32>
    %4 = vector.shape_cast %3 : vector<1x8x16xf32> to vector<8x16xf32>
    %c0_3 = arith.constant 0 : index
    %c0_4 = arith.constant 0 : index
    %5 = vector.load %arg10[%c0_3, %c0_4] : memref<16x8xf32, #tpu.memory_space<vmem>>, vector<16x8xf32>
    %cst = arith.constant dense<0.000000e+00> : vector<8x8xf32>
    %6 = tpu.matmul %4, %5, %cst {dimension_numbers = #tpu.dot_dimension_numbers<[1], [0], [0], [1], [0, 0, 1, 1], [], []>} : vector<8x16xf32>, vector<16x8xf32>, vector<8x8xf32> -> vector<8x8xf32>
    %c0_5 = arith.constant 0 : index
    %c0_6 = arith.constant 0 : index
    %c0_7 = arith.constant 0 : index
    %7 = vector.load %arg3[%c0_5, %c0_6, %c0_7] : memref<1x8x16xf32, #tpu.memory_space<vmem>>, vector<1x8x16xf32>
    %8 = vector.shape_cast %7 : vector<1x8x16xf32> to vector<8x16xf32>
    %c0_8 = arith.constant 0 : index
    %c0_9 = arith.constant 0 : index
    %9 = vector.load %arg5[%c0_8, %c0_9] : memref<16x8xf32, #tpu.memory_space<vmem>>, vector<16x8xf32>
    %cst_10 = arith.constant dense<0.000000e+00> : vector<8x8xf32>
    %10 = tpu.matmul %8, %9, %cst_10 {dimension_numbers = #tpu.dot_dimension_numbers<[1], [0], [0], [1], [0, 0, 1, 1], [], []>} : vector<8x16xf32>, vector<16x8xf32>, vector<8x8xf32> -> vector<8x8xf32>
    %11 = arith.addf %6, %10 : vector<8x8xf32>
    %c0_11 = arith.constant 0 : index
    %c0_12 = arith.constant 0 : index
    %12 = vector.load %arg6[%c0_11, %c0_12] : memref<1x8xf32, #tpu.memory_space<vmem>>, vector<1x8xf32>
    %13 = vector.broadcast %12 : vector<1x8xf32> to vector<8x8xf32>
    %14 = arith.addf %11, %13 : vector<8x8xf32>
    %cst_13 = arith.constant 0.000000e+00 : f32
    %15 = vector.broadcast %cst_13 : f32 to vector<8x8xf32>
    %16 = arith.maximumf %14, %15 : vector<8x8xf32>
    %c0_14 = arith.constant 0 : index
    %c0_15 = arith.constant 0 : index
    %c0_16 = arith.constant 0 : index
    %17 = vector.load %arg7[%c0_14, %c0_15, %c0_16] : memref<1x8x8xf32, #tpu.memory_space<vmem>>, vector<1x8x8xf32>
    %18 = vector.shape_cast %17 : vector<1x8x8xf32> to vector<8x8xf32>
    %19 = vector.shape_cast %16 : vector<8x8xf32> to vector<1x8x8xf32>
    tpu.vector_store %arg7[%c0_14, %c0_15, %c0_16], %19 {strides = array<i32>} : memref<1x8x8xf32, #tpu.memory_space<vmem>>, vector<1x8x8xf32>,
    %c0_17 = arith.constant 0 : index
    %c0_18 = arith.constant 0 : index
    %c0_19 = arith.constant 0 : index
    %20 = vector.load %arg8[%c0_17, %c0_18, %c0_19] : memref<1x1x8xf32, #tpu.memory_space<vmem>>, vector<1x1x8xf32>
    %21 = vector.shape_cast %20 : vector<1x1x8xf32> to vector<1x8xf32>
    %cst_20 = arith.constant dense<0.000000e+00> : vector<8xf32>
    %22 = vector.multi_reduction <add>, %16, %cst_20 [0] : vector<8x8xf32> to vector<8xf32>
    %23 = vector.shape_cast %22 : vector<8xf32> to vector<1x8xf32>
    %24 = arith.addf %21, %23 : vector<1x8xf32>
    %c0_21 = arith.constant 0 : index
    %c0_22 = arith.constant 0 : index
    %c0_23 = arith.constant 0 : index
    %25 = vector.load %arg8[%c0_21, %c0_22, %c0_23] : memref<1x1x8xf32, #tpu.memory_space<vmem>>, vector<1x1x8xf32>
    %26 = vector.shape_cast %25 : vector<1x1x8xf32> to vector<1x8xf32>
    %27 = vector.shape_cast %24 : vector<1x8xf32> to vector<1x1x8xf32>
    tpu.vector_store %arg8[%c0_21, %c0_22, %c0_23], %27 {strides = array<i32>} : memref<1x1x8xf32, #tpu.memory_space<vmem>>, vector<1x1x8xf32>,
    %c0_24 = arith.constant 0 : index
    %c0_25 = arith.constant 0 : index
    %c0_26 = arith.constant 0 : index
    %28 = vector.load %arg9[%c0_24, %c0_25, %c0_26] : memref<1x1x8xf32, #tpu.memory_space<vmem>>, vector<1x1x8xf32>
    %29 = vector.shape_cast %28 : vector<1x1x8xf32> to vector<1x8xf32>
    %30 = arith.mulf %16, %16 : vector<8x8xf32>
    %cst_27 = arith.constant dense<0.000000e+00> : vector<8xf32>
    %31 = vector.multi_reduction <add>, %30, %cst_27 [0] : vector<8x8xf32> to vector<8xf32>
    %32 = vector.shape_cast %31 : vector<8xf32> to vector<1x8xf32>
    %33 = arith.addf %29, %32 : vector<1x8xf32>
    %c0_28 = arith.constant 0 : index
    %c0_29 = arith.constant 0 : index
    %c0_30 = arith.constant 0 : index
    %34 = vector.load %arg9[%c0_28, %c0_29, %c0_30] : memref<1x1x8xf32, #tpu.memory_space<vmem>>, vector<1x1x8xf32>
    %35 = vector.shape_cast %34 : vector<1x1x8xf32> to vector<1x8xf32>
    %36 = vector.shape_cast %33 : vector<1x8xf32> to vector<1x1x8xf32>
    tpu.vector_store %arg9[%c0_28, %c0_29, %c0_30], %36 {strides = array<i32>} : memref<1x1x8xf32, #tpu.memory_space<vmem>>, vector<1x1x8xf32>,
    return
  }
  func.func @transform_0(%arg0: i32, %arg1: i32) -> (i32, i32, i32) {
    %c0_i32 = arith.constant 0 : i32
    %c0_i32_0 = arith.constant 0 : i32
    return %arg0, %arg1, %c0_i32 : i32, i32, i32
  }
  func.func @transform_1(%arg0: i32, %arg1: i32) -> (i32, i32, i32) {
    %c0_i32 = arith.constant 0 : i32
    %c0_i32_0 = arith.constant 0 : i32
    %c0_i32_1 = arith.constant 0 : i32
    return %arg0, %c0_i32, %c0_i32_0 : i32, i32, i32
  }
  func.func @transform_2(%arg0: i32, %arg1: i32) -> (i32, i32, i32) {
    %c0_i32 = arith.constant 0 : i32
    %c0_i32_0 = arith.constant 0 : i32
    %c0_i32_1 = arith.constant 0 : i32
    %c0_i32_2 = arith.constant 0 : i32
    return %c0_i32, %c0_i32_0, %c0_i32_1 : i32, i32, i32
  }
  func.func @transform_3(%arg0: i32, %arg1: i32) -> (i32, i32) {
    %c0_i32 = arith.constant 0 : i32
    %c0_i32_0 = arith.constant 0 : i32
    %c0_i32_1 = arith.constant 0 : i32
    return %c0_i32, %c0_i32_0 : i32, i32
  }
  func.func @transform_4(%arg0: i32, %arg1: i32) -> (i32, i32) {
    %c0_i32 = arith.constant 0 : i32
    %c0_i32_0 = arith.constant 0 : i32
    %c0_i32_1 = arith.constant 0 : i32
    return %c0_i32, %c0_i32_0 : i32, i32
  }
  func.func @transform_5(%arg0: i32, %arg1: i32) -> (i32, i32, i32) {
    %c0_i32 = arith.constant 0 : i32
    %c0_i32_0 = arith.constant 0 : i32
    return %arg0, %arg1, %c0_i32 : i32, i32, i32
  }
  func.func @transform_6(%arg0: i32, %arg1: i32) -> (i32, i32, i32) {
    %c0_i32 = arith.constant 0 : i32
    %c0_i32_0 = arith.constant 0 : i32
    %c0_i32_1 = arith.constant 0 : i32
    return %arg0, %c0_i32, %c0_i32_0 : i32, i32, i32
  }
  func.func @transform_7(%arg0: i32, %arg1: i32) -> (i32, i32, i32) {
    %c0_i32 = arith.constant 0 : i32
    %c0_i32_0 = arith.constant 0 : i32
    %c0_i32_1 = arith.constant 0 : i32
    return %arg0, %c0_i32, %c0_i32_0 : i32, i32, i32
  }
}

module attributes {stable_mosaic.version = 11 : i64} {
  func.func @_bn_apply_kernel(%arg0: i32, %arg1: i32, %arg2: memref<1x8x8xf32, #tpu.memory_space<vmem>>, %arg3: memref<1x8xf32, #tpu.memory_space<vmem>>, %arg4: memref<1x8xf32, #tpu.memory_space<vmem>>, %arg5: memref<1x8x8xf32, #tpu.memory_space<vmem>>) attributes {dimension_semantics = [#tpu.dimension_semantics<parallel>, #tpu.dimension_semantics<parallel>], iteration_bounds = array<i64: 2, 1>, scalar_prefetch = 0 : i64, scratch_operands = 0 : i64, tpu.core_type = #tpu.core_type<tc>, window_params = [{transform_indices = @transform_0, window_bounds = array<i64: 1, 8, 8>}, {pipeline_mode = #tpu.pipeline_mode<synchronous>, transform_indices = @transform_1, window_bounds = array<i64: 1, 8>}, {pipeline_mode = #tpu.pipeline_mode<synchronous>, transform_indices = @transform_2, window_bounds = array<i64: 1, 8>}, {transform_indices = @transform_3, window_bounds = array<i64: 1, 8, 8>}]} {
    %c0 = arith.constant 0 : index
    %c0_0 = arith.constant 0 : index
    %c0_1 = arith.constant 0 : index
    %0 = vector.load %arg2[%c0, %c0_0, %c0_1] : memref<1x8x8xf32, #tpu.memory_space<vmem>>, vector<1x8x8xf32>
    %1 = vector.shape_cast %0 : vector<1x8x8xf32> to vector<8x8xf32>
    %c0_2 = arith.constant 0 : index
    %c0_3 = arith.constant 0 : index
    %2 = vector.load %arg3[%c0_2, %c0_3] : memref<1x8xf32, #tpu.memory_space<vmem>>, vector<1x8xf32>
    %3 = vector.broadcast %2 : vector<1x8xf32> to vector<8x8xf32>
    %4 = arith.mulf %1, %3 : vector<8x8xf32>
    %c0_4 = arith.constant 0 : index
    %c0_5 = arith.constant 0 : index
    %5 = vector.load %arg4[%c0_4, %c0_5] : memref<1x8xf32, #tpu.memory_space<vmem>>, vector<1x8xf32>
    %6 = vector.broadcast %5 : vector<1x8xf32> to vector<8x8xf32>
    %7 = arith.addf %4, %6 : vector<8x8xf32>
    %c0_6 = arith.constant 0 : index
    %c0_7 = arith.constant 0 : index
    %c0_8 = arith.constant 0 : index
    %8 = vector.load %arg5[%c0_6, %c0_7, %c0_8] : memref<1x8x8xf32, #tpu.memory_space<vmem>>, vector<1x8x8xf32>
    %9 = vector.shape_cast %8 : vector<1x8x8xf32> to vector<8x8xf32>
    %10 = vector.shape_cast %7 : vector<8x8xf32> to vector<1x8x8xf32>
    tpu.vector_store %arg5[%c0_6, %c0_7, %c0_8], %10 {strides = array<i32>} : memref<1x8x8xf32, #tpu.memory_space<vmem>>, vector<1x8x8xf32>,
    return
  }
  func.func @transform_0(%arg0: i32, %arg1: i32) -> (i32, i32, i32) {
    %c0_i32 = arith.constant 0 : i32
    %c0_i32_0 = arith.constant 0 : i32
    return %arg0, %arg1, %c0_i32 : i32, i32, i32
  }
  func.func @transform_1(%arg0: i32, %arg1: i32) -> (i32, i32) {
    %c0_i32 = arith.constant 0 : i32
    %c0_i32_0 = arith.constant 0 : i32
    %c0_i32_1 = arith.constant 0 : i32
    return %c0_i32, %c0_i32_0 : i32, i32
  }
  func.func @transform_2(%arg0: i32, %arg1: i32) -> (i32, i32) {
    %c0_i32 = arith.constant 0 : i32
    %c0_i32_0 = arith.constant 0 : i32
    %c0_i32_1 = arith.constant 0 : i32
    return %c0_i32, %c0_i32_0 : i32, i32
  }
  func.func @transform_3(%arg0: i32, %arg1: i32) -> (i32, i32, i32) {
    %c0_i32 = arith.constant 0 : i32
    %c0_i32_0 = arith.constant 0 : i32
    return %arg0, %arg1, %c0_i32 : i32, i32, i32
  }
}

</mosaic_0001>

<bundles_post_ra>
// kernel: _lambda_.3
= control target key start
LH: loop header
LB: loop body
LE: loop exit
PB: predicated region body
PF: predicated region fallthrough
CT: control target
= control target key end

     0   :  { %8 = vsyncpa [#allocation3], 0  ;;  %s905_s0 = inlined_call_operand.hbm [shape: f32[2,8,8], index: 0, kind: input, shape index: {}, may-alias: {0,3}]   ;;  %s906_s1 = inlined_call_operand.hbm [shape: f32[1,8], index: 1, kind: input, shape index: {}]   ;;  %s907_s2 = inlined_call_operand.hbm [shape: f32[1,8], index: 2, kind: input, shape index: {}]   ;;  %s908_s3 = inlined_call_operand.hbm [shape: f32[2,8,8], index: 3, kind: output, shape index: {}, may-alias: {0,3}]  }
   0x1   :  { %10 = vsyncpa [#allocation3 + $0x1], 0 }
   0x2   :  { %11 = vsyncpa [#allocation6], 0 }
   0x3   :  { %12 = vsyncpa [#allocation4], 0 }
   0x4   :  { %14 = vsyncpa [#allocation4 + $0x1], 0  ;;  %s661_s12 = smov 0   ;;  %s663_s13 = smov 0  }
   0x5   :  { %s665_s14 = smov 0   ;;  %s667_s15 = smov 0  }
   0x6   :  { %s669_s16 = smov 0   ;;  %s671_s17 = smov 0  }
   0x7 LB: > { %s361_s18 = sadd.s32 4294967295, %s635_s17   ;;  %s362_s19 = sadd.s32 4294967294, %s635_s17   ;;  %s635_s17 = sphi %s671_s17, %s20_s17   ;;  %s631_s16 = sphi %s669_s16, %s931_s16   ;;  %s627_s15 = sphi %s667_s15, %s930_s15   ;;  %s623_s14 = sphi %s665_s14, %s929_s14   ;;  %s619_s13 = sphi %s663_s13, %s928_s13   ;;  %s615_s12 = sphi %s661_s12, %s927_s12  }
   0x8   : > { %p54_p0 = scmp.ne.s32.totalorder %s619_s13, %s615_s12  ;;  %p695_p1 = scmp.eq.s32.totalorder %s361_s18, 0 }
   0x9   : > { %p699_p2 = scmp.eq.s32.totalorder %s361_s18, 1  ;;  %p128_p3 = scmp.eq.s32.totalorder %s362_s19, 1 }
   0xa   : > { %s913_s20 = scalar_select %p695_p1, 1, 0 }
   0xb   : > { %s914_s21 = scalar_select %p699_p2, 1, 0 }
   0xc   : > { %p705_p4 = por %p695_p1, %p54_p0  ;;  %p363_p5 = scmp.ge.s32.totalorder %s635_s17, 1 }
   0xd   : > { %p710_p6 = por %p128_p3, %p54_p0  ;;  %p135_p7 = scmp.lt.s32.totalorder %s635_s17, 3 }
   0xe   : > { %s915_s22 = scalar_select %p705_p4, 1, 0 }
   0xf   : > { %s916_s23 = scalar_select %p710_p6, 1, 0 }
  0x10   : > { %p715_p8 = pnand %p363_p5, %p135_p7  ;;  %s637_s25 = smov [#allocation5]  }
  0x11   : > { %s148_s26 = sshll.u32 %s637_s25, 4  ;;  %s638_s27 = smov [#allocation7]   ;;  %s149_s26 = int_to_ptr.vmem [resolvable:$true] %s148_s26 }
  0x12   : > { %s917_s24 = scalar_select %p715_p8, 1, 0 }
  0x13   : > { %p392_p10 = pneg %p715_p8  ;;  %s159_s28 = sshll.u32 %s638_s27, 4  ;;  %s728_s28 = int_to_ptr.vmem [resolvable:$true] %s159_s28 }
  0x14   : > { %s463_s5 = scalar_lea.hbm %s906_s1, 16 }
  0x15   : > { %p724_p11 = pnand %p392_p10, %p695_p1  ;;  %p464_p12 = scmp.ne.s32.totalorder %s906_s1, %s463_s5 }
  0x16   : > { %p470_p5 = scmp.lt.u32.totalorder %s463_s5, %s906_s1 }
  0x17   : > { %p465_p13 = pneg %p724_p11 }
  0x19   : > { %p466_p0 = pnand %p465_p13, %p464_p12 }
  0x1b   : > { %p467_p3 = pneg %p466_p0 }
  0x1d   : > { %p472_p7 = pnand %p470_p5, %p467_p3 }
  0x1f   : > { %475 = shalt.err (!%p472_p7)
}
  0x20   : > { %s476_s10 = scalar_lea.vmem %s149_s26, 16  ;;  %s483_s11 = scalar_lea.vmem %s149_s26, 32 }
  0x21   : > { %p477_p10 = scmp.ne.s32.totalorder %s149_s26, %s476_s10  ;;  %p484_p1 = scmp.lt.s32.totalorder %s149_s26, %s149_s26 }
  0x22   : > { %p485_p4 = scmp.lt.s32.totalorder %s483_s11, %s476_s10 }
  0x23   : > { %p479_p9 = pnand %p477_p10, %p465_p13 }
  0x24   : > { %p486_p8 = por %p485_p4, %p484_p1 }
  0x25   : > { %p480_p6 = pneg %p479_p9 }
  0x27   : > { %p487_p2 = pnand %p486_p8, %p480_p6 }
  0x29   : > { %490 = shalt.err (!%p487_p2)
}
  0x2a   : > { %395 = dma.hbm_to_vmem [thread:$0]  (!%p724_p11), %s906_s1, 16, %s149_s26, [#allocation6]  }
  0x2b   : > { %s491_s30 = scalar_lea.hbm %s907_s2, 16 }
  0x2c   : > { %p492_p9 = scmp.ne.s32.totalorder %s907_s2, %s491_s30  ;;  %p498_p2 = scmp.lt.u32.totalorder %s491_s30, %s907_s2 }
  0x2e   : > { %p494_p1 = pnand %p492_p9, %p465_p13 }
  0x30   : > { %p495_p4 = pneg %p494_p1 }
  0x32   : > { %p500_p6 = pnand %p498_p2, %p495_p4 }
  0x34   : > { %503 = shalt.err (!%p500_p6)
}
  0x35   : > { %s504_s26 = scalar_lea.vmem %s728_s28, 16  ;;  %s511_s8 = scalar_lea.vmem %s728_s28, 32 }
  0x36   : > { %p505_p8 = scmp.ne.s32.totalorder %s728_s28, %s504_s26  ;;  %p512_p3 = scmp.lt.s32.totalorder %s728_s28, %s728_s28 }
  0x37   : > { %p513_p5 = scmp.lt.s32.totalorder %s511_s8, %s504_s26 }
  0x38   : > { %p507_p12 = pnand %p505_p8, %p465_p13 }
  0x39   : > { %p514_p7 = por %p513_p5, %p512_p3 }
  0x3a   : > { %p508_p0 = pneg %p507_p12 }
  0x3c   : > { %p515_p10 = pnand %p514_p7, %p508_p0 }
  0x3e   : > { %518 = shalt.err (!%p515_p10)
}
  0x3f   : > { %398 = dma.hbm_to_vmem [thread:$0]  (!%p724_p11), %s907_s2, 16, %s728_s28, [#allocation6]  }
  0x40   : > { %s32_s11 = sadd.s32 1, %s631_s16  ;;  %s41_s18 = sadd.s32 1, %s623_s14 }
  0x41   : > { %p34_p13 = scmp.ge.s32.totalorder %s32_s11, 2  ;;  %p48_p9 = scmp.ne.s32.totalorder %s623_s14, %s619_s13 }
  0x42   : > { %p49_p1 = scmp.eq.s32.totalorder %s635_s17, 0  ;;  %p409_p4 = scmp.lt.s32.totalorder %s635_s17, 2 }
  0x43   : > { %s933_s11 = smov (%p34_p13, %s32_s11), 0  ;;  %p919_p6 = scmp.ne.s32.totalorder %s914_s21, 0 }
  0x44   : > { %p50_p2 = por %p49_p1, %p48_p9  ;;  %s36_s19 = ssub.s32 %s631_s16, %s933_s11 }
  0x45   : > { %p788_p8 = por %p919_p6, %p48_p9  ;;  %s170_s25 = sand.u32 1, %s623_s14  }
  0x46   : > { %p39_p12 = scmp.eq.s32.totalorder %s36_s19, 0  ;;  %s367_s28 = sshll.u32 %s170_s25, 3 }
  0x47   : > { %s368_s27 = sshll.u32 %s631_s16, 7  ;;  %s174_s21 = scalar_lea.vmem [#allocation2], %s367_s28 }
  0x48   : > { %s797_s30 = scalar_select %p39_p12, %s623_s14, %s41_s18  }
  0x49   : > { %s802_s6 = scalar_lea.hbm %s905_s0, %s368_s27  ;;  %s182_s7 = sshll.u32 %s174_s21, 4  ;;  %s810_s7 = int_to_ptr.vmem [resolvable:$true] %s182_s7 }
  0x4a   : > { %p806_p11 = pnand %p409_p4, %p50_p2  ;;  %s171_s8 = scalar_lea.sflag [#allocation3], %s170_s25 }
  0x4b   : > { %s519_s9 = scalar_lea.hbm %s802_s6, 128  ;;  %s524_s19 = scalar_lea.hbm %s905_s0, 256 }
  0x4c   : > { %p520_p0 = scmp.ne.s32.totalorder %s802_s6, %s519_s9  ;;  %p521_p3 = pneg %p806_p11 }
  0x4d   : > { %p525_p10 = scmp.lt.u32.totalorder %s802_s6, %s905_s0  ;;  %p526_p13 = scmp.lt.u32.totalorder %s524_s19, %s519_s9 }
  0x4e   : > { %p522_p5 = pnand %p521_p3, %p520_p0  ;;  %p528_p1 = scmp.lt.u32.totalorder %s519_s9, %s802_s6 }
  0x4f   : > { %p527_p9 = por %p526_p13, %p525_p10 }
  0x50   : > { %p523_p7 = pneg %p522_p5 }
  0x51   : > { %p529_p4 = por %p528_p1, %p527_p9 }
  0x53   : > { %p530_p2 = pnand %p529_p4, %p523_p7 }
  0x55   : > { %533 = shalt.err (!%p530_p2)
}
  0x56   : > { %s534_s25 = scalar_lea.vmem %s810_s7, 128  ;;  %s639_s4 = smov [#allocation2]  }
  0x57   : > { %p535_p6 = scmp.ne.s32.totalorder %s810_s7, %s534_s25  ;;  %s539_s5 = sshll.u32 %s639_s4, 4  ;;  %s540_s5 = int_to_ptr.vmem [resolvable:$false] %s539_s5 }
  0x58   : > { %s541_s21 = scalar_lea.vmem %s540_s5, 256  ;;  %p542_p5 = scmp.lt.s32.totalorder %s810_s7, %s540_s5 }
  0x59   : > { %p537_p12 = pnand %p535_p6, %p521_p3  ;;  %p543_p10 = scmp.lt.s32.totalorder %s541_s21, %s534_s25 }
  0x5b   : > { %p538_p0 = pneg %p537_p12  ;;  %p544_p13 = por %p543_p10, %p542_p5 }
  0x5d   : > { %p545_p9 = pnand %p544_p13, %p538_p0 }
  0x5f   : > { %548 = shalt.err (!%p545_p9)
}
  0x60   : > { %402 = dma.hbm_to_vmem [thread:$0]  (!%p806_p11), %s802_s6, 128, %s810_s7, %s171_s8  }
  0x61   : > { %p922_p7 = scmp.ne.s32.totalorder %s917_s24, 0 }
  0x62   : > { %s840_s9 = sand.u32 (!%p922_p7), 1, %s619_s13   ;;  %p923_p3 = scmp.ne.s32.totalorder (!%p922_p7), %s915_s22, 0 }
  0x63   : > { %191 = sbr.rel (%p922_p7) target bundleno = 135 (0x87), region = 32  ;;  %s370_s10 = sshll.u32 (!%p922_p7), %s840_s9, 3 }
  0x64   : > { %s194_s18 = scalar_lea.sflag (!%p922_p7), [#allocation3], %s840_s9  ;;  %s197_s19 = scalar_lea.vmem (!%p922_p7), [#allocation2], %s370_s10 }
  0x6a   : > { %602 = dma.done.wait (%p923_p3), %s194_s18, 128  }
  0x6b   : > { %604 = vsyncadd (%p923_p3), %s194_s18, 4294967168  ;;  %p924_p1 = scmp.ne.s32.totalorder %s913_s20, 0 }
  0x6d   : > { %606 = dma.done.wait (%p924_p1), [#allocation6], 32  }
  0x6e   : > { %608 = vsyncadd (%p924_p1), [#allocation6], 4294967264  ;;  %s227_s24 = scalar_lea.vmem [#allocation8], %s370_s10  ;;  %v228_v0 = vld [vmem:[%s197_s19] sm:$0xff]  ;;  %v374_v1 = vld [vmem:[#allocation5] ss:$0 sm:$0xff] }
  0x6f   : > { %s262_s6 = sshll.u32 %s227_s24, 4  ;;  %v375_v2 = vld [vmem:[#allocation7] ss:$0 sm:$0xff]  ;;  %s377_s7 = sshll.u32 %s627_s15, 7  ;;  %v236_v3 = vmul.f32 %v374_v1, %v228_v0  ;;  %vm245_vm0 = vcmask 64512   ;;  %s853_s6 = int_to_ptr.vmem [resolvable:$true] %s262_s6 }
  0x70   : > { %s858_s20 = scalar_lea.hbm %s908_s3, %s377_s7  ;;  %s248_s8 = scalar_lea.sflag [#allocation4], %s840_s9 }
  0x71   : > { %v244_v4 = vadd.f32 %v375_v2, %v236_v3  ;;  %s549_s28 = scalar_lea.vmem %s853_s6, 128  ;;  %s640_s15 = smov [#allocation8]  }
  0x72   : > { %p550_p11 = scmp.ne.s32.totalorder %s853_s6, %s549_s28  ;;  %s553_s27 = sshll.u32 %s640_s15, 4  ;;  %s554_s27 = int_to_ptr.vmem [resolvable:$false] %s553_s27 }
  0x73   : > { %246 = vst.msk [vmem:[%s227_s24] sm:$0xff] %vm245_vm0, %v244_v4  ;;  %s555_s25 = scalar_lea.vmem %s554_s27, 256  ;;  %p556_p6 = scmp.lt.s32.totalorder %s853_s6, %s554_s27 }
  0x74   : > { %p551_p4 = pnand %p550_p11, %p788_p8  ;;  %p557_p12 = scmp.lt.s32.totalorder %s555_s25, %s549_s28 }
  0x76   : > { %p552_p2 = pneg %p551_p4  ;;  %p558_p0 = por %p557_p12, %p556_p6 }
  0x78   : > { %p559_p5 = pnand %p558_p0, %p552_p2 }
  0x7a   : > { %562 = shalt.err (!%p559_p5)
}
  0x7b   : > { %s563_s4 = scalar_lea.hbm %s858_s20, 128  ;;  %s567_s9 = scalar_lea.hbm %s908_s3, 256 }
  0x7c   : > { %p564_p10 = scmp.ne.s32.totalorder %s858_s20, %s563_s4  ;;  %p568_p7 = scmp.lt.u32.totalorder %s858_s20, %s908_s3 }
  0x7d   : > { %p569_p3 = scmp.lt.u32.totalorder %s567_s9, %s563_s4  ;;  %p571_p11 = scmp.lt.u32.totalorder %s563_s4, %s858_s20 }
  0x7e   : > { %p565_p13 = pnand %p564_p10, %p788_p8 }
  0x7f   : > { %p570_p1 = por %p569_p3, %p568_p7 }
  0x80   : > { %p566_p9 = pneg %p565_p13 }
  0x81   : > { %p572_p4 = por %p571_p11, %p570_p1 }
  0x83   : > { %p573_p2 = pnand %p572_p4, %p566_p9 }
  0x85   : > { %576 = shalt.err (!%p573_p2)
}
  0x86   : > { %390 = dma.vmem_to_hbm [thread:$0]  (%p788_p8), %s853_s6, 128, %s858_s20, %s248_s8  }
  0x87 PF: > { %s274_s19 = sand.u32 1, %s615_s12   ;;  %p925_p6 = scmp.ne.s32.totalorder %s916_s23, 0 }
  0x88   : > { %p926_p12 = scmp.ge.s32.totalorder %s635_s17, 2  ;;  %s275_s24 = scalar_lea.sflag [#allocation4], %s274_s19 }
  0x8a   : > { %p404_p0 = pnand %p926_p12, %p925_p6 }
  0x8c   : > { %610 = dma.done.wait (!%p404_p0), %s275_s24, 128  }
  0x8d   : > { %612 = vsyncadd (!%p404_p0), %s275_s24, 4294967168  ;;  %s20_s17 = sadd.s32 1, %s635_s17   ;;  %s927_s12 = smov %s619_s13 }
  0x8e   : > { %p17_p5 = scmp.ge.s32.totalorder %s20_s17, 4   ;;  %s928_s13 = smov %s623_s14 }
  0x8f   : > { %s929_s14 = smov %s797_s30  ;;  %s930_s15 = smov %s631_s16 }
  0x90   : > { %s931_s16 = smov %s933_s11  ;;  %19 = sbr.rel (!%p17_p5) target bundleno = 7 (0x7), region = 85 }
  0x97   :  { %280 = vsyncpa [#allocation3], 1 }
  0x98   :  { %282 = vsyncpa [#allocation3 + $0x1], 1 }
  0x99   :  { %283 = vsyncpa [#allocation6], 1 }
  0x9a   :  { %284 = vsyncpa [#allocation4], 1 }
  0x9b   :  { %286 = vsyncpa [#allocation4 + $0x1], 1 }

// kernel: _lambda_.2
= control target key start
LH: loop header
LB: loop body
LE: loop exit
PB: predicated region body
PF: predicated region fallthrough
CT: control target
= control target key end

     0   :  { %s1945_s0 = inlined_call_operand.hbm [shape: f32[2,8,16], index: 0, kind: input, shape index: {}]   ;;  %s1946_s1 = inlined_call_operand.hbm [shape: f32[2,8,16], index: 1, kind: input, shape index: {}]   ;;  %s1947_s2 = inlined_call_operand.hbm [shape: f32[2,16,8], index: 2, kind: input, shape index: {}]   ;;  %s1948_s3 = inlined_call_operand.hbm [shape: f32[16,8], index: 3, kind: input, shape index: {}]   ;;  %s1949_s4 = inlined_call_operand.hbm [shape: f32[1,8], index: 4, kind: input, shape index: {}]   ;;  %s1950_s5 = inlined_call_operand.hbm [shape: f32[2,8,8], index: 5, kind: output, shape index: {0}]   ;;  %s1951_s6 = inlined_call_operand.hbm [shape: f32[2,1,8], index: 6, kind: output, shape index: {1}]   ;;  %s1952_s7 = inlined_call_operand.hbm [shape: f32[2,1,8], index: 7, kind: output, shape index: {2}]  }
   0x1   :  { %1961 = sst [smem:[#allocation24_spill]] %s1947_s2 }
   0x2   :  { %1962 = sst [smem:[#allocation25_spill]] %s1948_s3 }
   0x3   :  { %1963 = sst [smem:[#allocation26_spill]] %s1949_s4 }
   0x4   :  { %1964 = sst [smem:[#allocation27_spill]] %s1952_s7 }
   0x5   :  { %13 = vsyncpa [#allocation4], 0 }
   0x6   :  { %15 = vsyncpa [#allocation4 + $0x1], 0 }
   0x7   :  { %16 = vsyncpa [#allocation7], 0 }
   0x8   :  { %18 = vsyncpa [#allocation7 + $0x1], 0 }
   0x9   :  { %19 = vsyncpa [#allocation10], 0 }
   0xa   :  { %20 = vsyncpa [#allocation5], 0 }
   0xb   :  { %22 = vsyncpa [#allocation5 + $0x1], 0 }
   0xc   :  { %23 = vsyncpa [#allocation14], 0 }
   0xd   :  { %25 = vsyncpa [#allocation14 + $0x1], 0  ;;  %s1531_s24 = smov 0   ;;  %s1533_s25 = smov 0  }
   0xe   :  { %s1535_s26 = smov 0   ;;  %s1537_s27 = smov 0  }
   0xf   :  { %s1539_s28 = smov 0   ;;  %s1541_s29 = smov 0  }
  0x10 LB: > { %1965 = sst [smem:[#allocation22_spill]] %s1456_s24  ;;  %s1562_s30 = sadd.s32 4294967295, %s1476_s29   ;;  %s1476_s29 = sphi %s1541_s29, %s31_s29   ;;  %s1472_s28 = sphi %s1539_s28, %s1995_s28   ;;  %s1468_s27 = sphi %s1537_s27, %s1994_s27   ;;  %s1464_s26 = sphi %s1535_s26, %s1993_s26   ;;  %s1460_s25 = sphi %s1533_s25, %s1992_s25   ;;  %s1456_s24 = sphi %s1531_s24, %s1991_s24  }
  0x11   : > { %s1954_s8 = sadd.s32 4294967294, %s1476_s29   ;;  %p65_p0 = scmp.ne.s32.totalorder %s1460_s25, %s1456_s24 }
  0x12   : > { %p1953_p1 = scmp.eq.s32.totalorder %s1562_s30, 0  ;;  %p186_p3 = scmp.eq.s32.totalorder %s1954_s8, 1 }
  0x13   : > { %p986_p5 = scmp.ge.s32.totalorder %s1476_s29, 1  ;;  %p245_p7 = scmp.lt.s32.totalorder %s1476_s29, 3 }
  0x14   : > { %p1573_p4 = por %p1953_p1, %p65_p0  ;;  %p1578_p6 = por %p186_p3, %p65_p0 }
  0x15   : > { %p1583_p8 = pnand %p986_p5, %p245_p7  ;;  %s1478_s12 = smov [#allocation8]  }
  0x16   : > { %s1966_s9 = scalar_select %p1573_p4, 1, 0 }
  0x17   : > { %s1967_s10 = scalar_select %p1578_p6, 1, 0 }
  0x18   : > { %s1969_s11 = scalar_select %p1583_p8, 1, 0 }
  0x19   : > { %1968 = sst [smem:[#allocation23_spill]] %s1967_s10  ;;  %s257_s13 = sshll.u32 %s1478_s12, 4  ;;  %s1587_s13 = int_to_ptr.vmem [resolvable:$true] %s257_s13 }
  0x1a   : > { %p1087_p9 = pneg %p1583_p8  ;;  %s1479_s15 = smov [#allocation9]  }
  0x1b   : > { %s270_s16 = sshll.u32 %s1479_s15, 4  ;;  %s1480_s17 = smov [#allocation11]   ;;  %s1598_s16 = int_to_ptr.vmem [resolvable:$true] %s270_s16 }
  0x1c   : > { %p1594_p11 = pnand %p1087_p9, %p1953_p1  ;;  %s1600_s18 = sshll.u32 %s1480_s17, 4  ;;  %s285_s18 = int_to_ptr.vmem [resolvable:$true] %s1600_s18 }
  0x1d   : > { %s1971_s2 = sld [smem:[#allocation24_spill]] }
  0x1e   : > { %p1610_p13 = pneg %p1594_p11 }
  0x23   : > { %s1178_s21 = scalar_lea.hbm %s1971_s2, 512 }
  0x24   : > { %p1179_p12 = scmp.ne.s32.totalorder %s1971_s2, %s1178_s21  ;;  %p1185_p5 = scmp.lt.u32.totalorder %s1178_s21, %s1971_s2 }
  0x26   : > { %p1181_p0 = pnand %p1610_p13, %p1179_p12 }
  0x28   : > { %p1182_p3 = pneg %p1181_p0 }
  0x2a   : > { %p1187_p7 = pnand %p1185_p5, %p1182_p3 }
  0x2c   : > { %1190 = shalt.err (!%p1187_p7)
}
  0x2d   : > { %s1191_s19 = scalar_lea.vmem %s1587_s13, 512  ;;  %p1199_p2 = scmp.lt.s32.totalorder %s1587_s13, %s1587_s13 }
  0x2e   : > { %p1192_p9 = scmp.ne.s32.totalorder %s1587_s13, %s1191_s19  ;;  %p1200_p6 = scmp.lt.s32.totalorder %s1191_s19, %s1191_s19 }
  0x30   : > { %p1194_p10 = pnand %p1192_p9, %p1610_p13  ;;  %p1201_p12 = por %p1200_p6, %p1199_p2 }
  0x32   : > { %p1195_p1 = pneg %p1194_p10 }
  0x34   : > { %p1202_p0 = pnand %p1201_p12, %p1195_p1 }
  0x36   : > { %1205 = shalt.err (!%p1202_p0)
}
  0x37   : > { %s1481_s20 = smov 128   ;;  %s1482_s21 = smov 8  }
  0x38   : > { %1090 = dma.hbm_to_vmem [thread:$0]  (!%p1594_p11), %s1971_s2, 512, %s1587_s13, [#allocation7], %s1481_s20, %s1481_s20, %s1482_s21  }
  0x39   : > { %s1973_s3 = sld [smem:[#allocation25_spill]] }
  0x3f   : > { %s1206_s8 = scalar_lea.hbm %s1973_s3, 256 }
  0x40   : > { %p1207_p2 = scmp.ne.s32.totalorder %s1973_s3, %s1206_s8  ;;  %p1213_p10 = scmp.lt.u32.totalorder %s1206_s8, %s1973_s3 }
  0x42   : > { %p1209_p1 = pnand %p1207_p2, %p1610_p13 }
  0x44   : > { %p1210_p6 = pneg %p1209_p1 }
  0x46   : > { %p1215_p3 = pnand %p1213_p10, %p1210_p6 }
  0x48   : > { %1218 = shalt.err (!%p1215_p3)
}
  0x49   : > { %s1219_s13 = scalar_lea.vmem %s1598_s16, 256  ;;  %p1227_p12 = scmp.lt.s32.totalorder %s1598_s16, %s1598_s16 }
  0x4a   : > { %p1220_p5 = scmp.ne.s32.totalorder %s1598_s16, %s1219_s13  ;;  %p1228_p0 = scmp.lt.s32.totalorder %s1219_s13, %s1219_s13 }
  0x4c   : > { %p1222_p7 = pnand %p1220_p5, %p1610_p13  ;;  %p1229_p2 = por %p1228_p0, %p1227_p12 }
  0x4e   : > { %p1223_p9 = pneg %p1222_p7 }
  0x50   : > { %p1230_p1 = pnand %p1229_p2, %p1223_p9 }
  0x52   : > { %1233 = shalt.err (!%p1230_p1)
}
  0x53   : > { %1093 = dma.hbm_to_vmem [thread:$0]  (!%p1594_p11), %s1973_s3, 256, %s1598_s16, [#allocation10], %s1481_s20, %s1481_s20, %s1482_s21  }
  0x54   : > { %s1974_s4 = sld [smem:[#allocation26_spill]] }
  0x5a   : > { %s1234_s22 = scalar_lea.hbm %s1974_s4, 16 }
  0x5b   : > { %p1235_p6 = scmp.ne.s32.totalorder %s1974_s4, %s1234_s22  ;;  %p1241_p5 = scmp.lt.u32.totalorder %s1234_s22, %s1974_s4 }
  0x5d   : > { %p1237_p10 = pnand %p1235_p6, %p1610_p13 }
  0x5f   : > { %p1238_p3 = pneg %p1237_p10 }
  0x61   : > { %p1243_p7 = pnand %p1241_p5, %p1238_p3 }
  0x63   : > { %1246 = shalt.err (!%p1243_p7)
}
  0x64   : > { %s1247_s13 = scalar_lea.vmem %s285_s18, 16  ;;  %s1254_s16 = scalar_lea.vmem %s285_s18, 32 }
  0x65   : > { %p1248_p9 = scmp.ne.s32.totalorder %s285_s18, %s1247_s13  ;;  %p1255_p2 = scmp.lt.s32.totalorder %s285_s18, %s285_s18 }
  0x66   : > { %p1256_p1 = scmp.lt.s32.totalorder %s1254_s16, %s1247_s13 }
  0x67   : > { %p1250_p12 = pnand %p1248_p9, %p1610_p13 }
  0x68   : > { %p1257_p4 = por %p1256_p1, %p1255_p2 }
  0x69   : > { %p1251_p0 = pneg %p1250_p12 }
  0x6b   : > { %p1258_p8 = pnand %p1257_p4, %p1251_p0 }
  0x6d   : > { %1261 = shalt.err (!%p1258_p8)
}
  0x6e   : > { %1096 = dma.hbm_to_vmem [thread:$0]  (!%p1594_p11), %s1974_s4, 16, %s285_s18, [#allocation10]  }
  0x6f   : > { %s52_s12 = sadd.s32 1, %s1464_s26  ;;  %s43_s7 = sadd.s32 1, %s1472_s28 }
  0x70   : > { %p59_p4 = scmp.ne.s32.totalorder %s1464_s26, %s1460_s25  ;;  %p45_p8 = scmp.ge.s32.totalorder %s43_s7, 2 }
  0x71   : > { %p60_p13 = scmp.eq.s32.totalorder %s1476_s29, 0  ;;  %p1975_p6 = scmp.eq.s32.totalorder %s1562_s30, 1 }
  0x72   : > { %p1117_p3 = scmp.lt.s32.totalorder %s1476_s29, 2  ;;  %s1997_s7 = smov (%p45_p8, %s43_s7), 0 }
  0x73   : > { %p1680_p10 = por %p1975_p6, %p59_p4  ;;  %p61_p5 = por %p60_p13, %p59_p4 }
  0x74   : > { %s295_s24 = sand.u32 1, %s1464_s26   ;;  %s47_s8 = ssub.s32 %s1472_s28, %s1997_s7 }
  0x75   : > { %s1976_s14 = scalar_select %p1680_p10, 1, 0 }
  0x76   : > { %p50_p11 = scmp.eq.s32.totalorder %s47_s8, 0  ;;  %s1690_s18 = sshll.u32 %s295_s24, 3 }
  0x77   : > { %s992_s10 = sshll.u32 %s1472_s28, 7  ;;  %s299_s19 = scalar_lea.vmem [#allocation3], %s1690_s18 }
  0x78   : > { %s1694_s22 = scalar_select %p50_p11, %s1464_s26, %s52_s12  }
  0x79   : > { %s1699_s17 = scalar_lea.hbm %s1945_s0, %s992_s10  ;;  %s307_s13 = sshll.u32 %s299_s19, 4  ;;  %s1702_s13 = int_to_ptr.vmem [resolvable:$true] %s307_s13 }
  0x7a   : > { %p1706_p7 = pnand %p1117_p3, %p61_p5  ;;  %s1713_s12 = scalar_lea.hbm %s1946_s1, %s992_s10 }
  0x7b   : > { %s314_s8 = sand.u32 1, %s1476_s29   ;;  %s296_s23 = scalar_lea.sflag [#allocation4], %s295_s24 }
  0x7c   : > { %s1262_s15 = scalar_lea.hbm %s1699_s17, 128  ;;  %p1264_p12 = pneg %p1706_p7 }
  0x7d   : > { %p1263_p9 = scmp.ne.s32.totalorder %s1699_s17, %s1262_s15  ;;  %s1267_s3 = scalar_lea.hbm %s1945_s0, 256 }
  0x7e   : > { %p1268_p1 = scmp.lt.u32.totalorder %s1699_s17, %s1945_s0  ;;  %p1269_p4 = scmp.lt.u32.totalorder %s1267_s3, %s1262_s15 }
  0x7f   : > { %p1265_p0 = pnand %p1264_p12, %p1263_p9  ;;  %p1271_p13 = scmp.lt.u32.totalorder %s1262_s15, %s1699_s17 }
  0x80   : > { %p1270_p8 = por %p1269_p4, %p1268_p1 }
  0x81   : > { %p1266_p2 = pneg %p1265_p0 }
  0x82   : > { %p1272_p6 = por %p1271_p13, %p1270_p8 }
  0x84   : > { %p1273_p3 = pnand %p1272_p6, %p1266_p2 }
  0x86   : > { %1276 = shalt.err (!%p1273_p3)
}
  0x87   : > { %s1277_s24 = scalar_lea.vmem %s1702_s13, 128  ;;  %s1483_s2 = smov [#allocation3]  }
  0x88   : > { %p1278_p5 = scmp.ne.s32.totalorder %s1702_s13, %s1277_s24  ;;  %s1282_s10 = sshll.u32 %s1483_s2, 4  ;;  %s1283_s10 = int_to_ptr.vmem [resolvable:$false] %s1282_s10 }
  0x89   : > { %s1284_s4 = scalar_lea.vmem %s1283_s10, 256  ;;  %p1285_p0 = scmp.lt.s32.totalorder %s1702_s13, %s1283_s10 }
  0x8a   : > { %p1280_p11 = pnand %p1278_p5, %p1264_p12  ;;  %p1286_p1 = scmp.lt.s32.totalorder %s1284_s4, %s1277_s24 }
  0x8c   : > { %p1281_p9 = pneg %p1280_p11  ;;  %p1287_p4 = por %p1286_p1, %p1285_p0 }
  0x8e   : > { %p1288_p8 = pnand %p1287_p4, %p1281_p9 }
  0x90   : > { %1291 = shalt.err (!%p1288_p8)
}
  0x91   : > { %1100 = dma.hbm_to_vmem [thread:$0]  (!%p1706_p7), %s1699_s17, 128, %s1702_s13, %s296_s23  }
  0x92   : > { %s318_s3 = scalar_lea.vmem [#allocation6], %s1690_s18  ;;  %s315_s15 = scalar_lea.sflag [#allocation7], %s314_s8 }
  0x93   : > { %s325_s21 = sshll.u32 %s318_s3, 4  ;;  %s1292_s19 = scalar_lea.hbm %s1713_s12, 128  ;;  %s326_s21 = int_to_ptr.vmem [resolvable:$true] %s325_s21 }
  0x94   : > { %p1293_p2 = scmp.ne.s32.totalorder %s1713_s12, %s1292_s19  ;;  %s1297_s2 = scalar_lea.hbm %s1946_s1, 256 }
  0x95   : > { %p1298_p3 = scmp.lt.u32.totalorder %s1713_s12, %s1946_s1  ;;  %p1299_p5 = scmp.lt.u32.totalorder %s1297_s2, %s1292_s19 }
  0x96   : > { %p1295_p13 = pnand %p1293_p2, %p1264_p12  ;;  %p1301_p9 = scmp.lt.u32.totalorder %s1292_s19, %s1713_s12 }
  0x97   : > { %p1300_p11 = por %p1299_p5, %p1298_p3 }
  0x98   : > { %p1296_p6 = pneg %p1295_p13 }
  0x99   : > { %p1302_p0 = por %p1301_p9, %p1300_p11 }
  0x9b   : > { %p1303_p1 = pnand %p1302_p0, %p1296_p6 }
  0x9d   : > { %1306 = shalt.err (!%p1303_p1)
}
  0x9e   : > { %s1307_s18 = scalar_lea.vmem %s326_s21, 128  ;;  %s1484_s17 = smov [#allocation6]  }
  0x9f   : > { %p1308_p4 = scmp.ne.s32.totalorder %s326_s21, %s1307_s18  ;;  %s1312_s13 = sshll.u32 %s1484_s17, 4  ;;  %s1313_s13 = int_to_ptr.vmem [resolvable:$false] %s1312_s13 }
  0xa0   : > { %s1314_s8 = scalar_lea.vmem %s1313_s13, 256  ;;  %p1315_p13 = scmp.lt.s32.totalorder %s326_s21, %s1313_s13 }
  0xa1   : > { %p1310_p8 = pnand %p1308_p4, %p1264_p12  ;;  %p1316_p10 = scmp.lt.s32.totalorder %s1314_s8, %s1307_s18 }
  0xa3   : > { %p1311_p2 = pneg %p1310_p8  ;;  %p1317_p3 = por %p1316_p10, %p1315_p13 }
  0xa5   : > { %p1318_p5 = pnand %p1317_p3, %p1311_p2 }
  0xa7   : > { %1321 = shalt.err (!%p1318_p5)
}
  0xa8   : > { %1103 = dma.hbm_to_vmem [thread:$0]  (!%p1706_p7), %s1713_s12, 128, %s326_s21, %s315_s15  }
  0xa9   : > { %p1978_p6 = scmp.ne.s32.totalorder %s1969_s11, 0 }
  0xaa   : > { %s1766_s23 = sand.u32 (!%p1978_p6), 1, %s1460_s25   ;;  %p1979_p10 = scmp.ne.s32.totalorder (!%p1978_p6), %s1966_s9, 0 }
  0xab   : > { %334 = sbr.rel (%p1978_p6) target bundleno = 706 (0x2c2), region = 40  ;;  %s1769_s3 = sshll.u32 (!%p1978_p6), %s1766_s23, 3 }
  0xac   : > { %s337_s19 = scalar_lea.sflag (!%p1978_p6), [#allocation4], %s1766_s23  ;;  %s340_s20 = scalar_lea.vmem (!%p1978_p6), [#allocation3], %s1769_s3 }
  0xb2   : > { %1431 = dma.done.wait (%p1979_p10), %s337_s19, 128  }
  0xb3   : > { %1433 = vsyncadd (%p1979_p10), %s337_s19, 4294967168  ;;  %s345_s11 = sand.u32 1, %s1562_s30   ;;  %s349_s12 = scalar_lea.vmem [#allocation6], %s1769_s3 }
  0xb4   : > { %s346_s16 = scalar_lea.sflag [#allocation7], %s345_s11 }
  0xb5   : > { %1435 = dma.done.wait (%p1979_p10), %s346_s16, 128  }
  0xb6   : > { %1437 = vsyncadd (%p1979_p10), %s346_s16, 4294967168  ;;  %p1980_p7 = scmp.eq.s32.totalorder %s1562_s30, 0 }
  0xb8   : > { %1439 = dma.done.wait (%p1980_p7), [#allocation7], 512   ;;  %p1981_p12 = pmov %p1980_p7 }
  0xb9   : > { %p1982_p11 = pmov %p1980_p7 }
  0xba   : > { %1441 = vsyncadd (%p1981_p12), [#allocation7], 4294966784 }
  0xbb   : > { %1443 = dma.done.wait (%p1982_p11), [#allocation10], 272   ;;  %p1983_p9 = pmov %p1980_p7 }
  0xbc   : > { %v1485_v0 = vmov 0.0|0.0   ;;  %vm1486_vm0 = vmmov 0   ;;  %v1487_v1 = vmov 0.0   ;;  %v410_v2 = vld [vmem:[#allocation8] sm:$0xff]  ;;  %v411_v3 = vld [vmem:[#allocation8 + $0x8] sm:$0xff]  ;;  %v489_v4 = vld [vmem:[#allocation8 + $0x10] sm:$0xff] }
  0xbd   : > { %1445 = vsyncadd (%p1983_p9), [#allocation10], 4294967024  ;;  %1053 = vmatprep.subr.bf16.mxu0 %v1485_v0  ;;  %1056 = vmatprep.subr.bf16.mxu1 %v1485_v0  ;;  %v1054_v5 = vpack.c.bf16 %v411_v3, %v410_v2  ;;  %v490_v6 = vld [vmem:[#allocation8 + $0x18] sm:$0xff]  ;;  %vm412_vm1 = vcmask 130048   ;;  %v569_v9 = vld [vmem:[#allocation9] sm:$0xff]  ;;  %vm486_vm2 = vcmask 64512  }
  0xbe   : > { %1029 = vmatprep.mubr.msk.f32.mxu0 %vm1486_vm0, %v1487_v1  ;;  %1036 = vmatprep.mubr.msk.f32.mxu1 %vm1486_vm0, %v1487_v1  ;;  %v1057_v7 = vpack.c.bf16 %v490_v6, %v489_v4  ;;  %v409_v8 = vld [vmem:[%s349_s12] sm:$0xff]  ;;  %v570_v10 = vld [vmem:[#allocation9 + $0x8] sm:$0xff]  ;;  %vm562_vm3 = vcmask 57344   ;;  %s1806_s9 = scalar_lea.vmem [#allocation13], %s1766_s23  ;;  %s1811_s21 = scalar_lea.vmem [#allocation15], %s1766_s23 }
  0xbf   : > { %1055 = vmatpush3.bf16.msra.mxu0 %v1054_v5  ;;  %v1060_v11 = vpack.c.bf16 %v570_v10, %v569_v9  ;;  %v565_v19 = vld [vmem:[%s340_s20] sm:$0xff]  ;;  %563 = vst.msk [vmem:[%s1806_s9] sm:$0x1] %vm562_vm3, %v1487_v1  ;;  %564 = vst.msk [vmem:[%s1811_s21] sm:$0x1] %vm562_vm3, %v1487_v1  ;;  %s1008_s15 = sshll.u32 %s1468_s27, 7 }
  0xc0   : > { %1058 = vmatpush3.bf16.msra.mxu1 %v1057_v7  ;;  %1059 = vmatprep.subr.bf16.mxu0 %v1485_v0  ;;  %v1006_v23 = vld [vmem:[#allocation11] ss:$0 sm:$0xff]  ;;  %s392_s24 = scalar_lea.vmem [#allocation12], %s1769_s3  ;;  %s1820_s18 = scalar_lea.hbm %s1950_s5, %s1008_s15 }
  0xc1   : > { %1062 = vmatprep.subr.bf16.mxu1 %v1485_v0  ;;  %s774_s2 = sshll.u32 %s392_s24, 4  ;;  %s752_s17 = scalar_lea.sflag [#allocation5], %s1766_s23  ;;  %s1822_s2 = int_to_ptr.vmem [resolvable:$true] %s774_s2 }
  0xc2   : > { %1030 = vmatmul.mubr.msk.f32.vlgmr.msra.gmra.mrb[0].mxu0 %vm412_vm1, %v409_v8  ;;  %s1322_s13 = scalar_lea.vmem %s1822_s2, 128  ;;  %p1984_p1 = scmp.ne.s32.totalorder %s1976_s14, 0 }
  0xc3   : > { %1037 = vmatmul.mubr.msk.f32.vlgmr.msra.gmra.mrb[0].mxu1 %vm412_vm1, %v409_v8  ;;  %1043 = vmatprep.mubr.msk.f32.mxu0 %vm1486_vm0, %v1487_v1  ;;  %p1323_p0 = scmp.ne.s32.totalorder %s1822_s2, %s1322_s13  ;;  %s1488_s8 = smov [#allocation12]  }
  0xc4   : > { %1050 = vmatprep.mubr.msk.f32.mxu1 %vm1486_vm0, %v1487_v1  ;;  %1061 = vmatpush3.bf16.msra.mxu0 %v1060_v11  ;;  %s1326_s3 = sshll.u32 %s1488_s8, 4  ;;  %s1327_s3 = int_to_ptr.vmem [resolvable:$false] %s1326_s3 }
  0xc5   : > { %p1324_p4 = pnand %p1323_p0, %p1984_p1  ;;  %s1328_s19 = scalar_lea.vmem %s1327_s3, 256 }
  0xc6   : > { %p1329_p2 = scmp.lt.s32.totalorder %s1822_s2, %s1327_s3  ;;  %p1330_p13 = scmp.lt.s32.totalorder %s1328_s19, %s1322_s13 }
  0xc7   : > { %1044 = vmatmul.mubr.msk.f32.vlgmr.msra.gmra.mrb[2].mxu0 %vm412_vm1, %v409_v8  ;;  %p1325_p8 = pneg %p1324_p4 }
  0xc8   : > { %p1331_p3 = por %p1330_p13, %p1329_p2 }
  0xca   : > { %p1332_p5 = pnand %p1331_p3, %p1325_p8 }
 0x195   : > { %v482_v12 = vpop.f32.mrb[0].mxu0 }
 0x196   : > { %487 = vst.msk [vmem:[#allocation2] sm:$0xff] %vm486_vm2, %v482_v12  ;;  %v557_v13 = vpop.f32.mrb[0].mxu1  ;;  %v1031_v14 = vpop.f32.mrb[1].mxu0 }
 0x197   : > { %561 = vst.msk [vmem:[#allocation2 + $0x8] sm:$0xff] %vm486_vm2, %v557_v13  ;;  %v1038_v15 = vpop.f32.mrb[1].mxu1 }
 0x19a   : > { %v641_v20 = vpop.f32.mrb[2].mxu0 }
 0x19b   : > { %v1045_v21 = vpop.f32.mrb[3].mxu0 }
 0x19d   : > { %v566_v16 = vld [vmem:[#allocation2] sm:$0xff] }
 0x19e   : > { %v567_v17 = vld [vmem:[#allocation2 + $0x8] sm:$0xff] }
 0x19f   : > { %v1063_v18 = vpack.c.bf16 %v567_v17, %v566_v16 }
 0x1a1   : > { %1064 = vmatpush3.bf16.msra.mxu1 %v1063_v18 }
 0x1a4   : > { %1051 = vmatmul.mubr.msk.f32.vlgmr.msra.gmra.mrb[2].mxu1 %vm412_vm1, %v565_v19 }
 0x277   : > { %v714_v22 = vpop.f32.mrb[2].mxu1 }
 0x278   : > { %v715_v24 = vadd.f32 %v714_v22, %v641_v20  ;;  %v1052_v25 = vpop.f32.mrb[3].mxu1 }
 0x27a   : > { %v725_v26 = vadd.f32 %v1006_v23, %v715_v24 }
 0x27c   : > { %v726_v27 = vmax.f32 %v725_v26, 0.0 }
 0x27e   : > { %v730_v28 = vsel %vm486_vm2, %v726_v27, 0.0  ;;  %v741_v29 = vmul.f32 %v726_v27, %v726_v27  ;;  %728 = vst.msk [vmem:[%s392_s24] sm:$0xff] %vm486_vm2, %v726_v27 }
 0x27f   : > { %v731_v30 = vrot.slane %v730_v28, 4 }
 0x280   : > { %1335 = shalt.err (!%p1332_p5)
}
 0x281   : > { %s1336_s23 = scalar_lea.hbm %s1820_s18, 128  ;;  %s1340_s12 = scalar_lea.hbm %s1950_s5, 256 }
 0x282   : > { %p1337_p6 = scmp.ne.s32.totalorder %s1820_s18, %s1336_s23  ;;  %p1341_p12 = scmp.lt.u32.totalorder %s1820_s18, %s1950_s5 }
 0x283   : > { %p1342_p11 = scmp.lt.u32.totalorder %s1340_s12, %s1336_s23  ;;  %p1344_p0 = scmp.lt.u32.totalorder %s1336_s23, %s1820_s18 }
 0x284   : > { %p1338_p10 = pnand %p1337_p6, %p1984_p1 }
 0x285   : > { %p1343_p9 = por %p1342_p11, %p1341_p12 }
 0x286   : > { %p1339_p7 = pneg %p1338_p10 }
 0x287   : > { %p1345_p4 = por %p1344_p0, %p1343_p9 }
 0x289   : > { %p1346_p8 = pnand %p1345_p4, %p1339_p7 }
 0x28b   : > { %1349 = shalt.err (!%p1346_p8)
}
 0x28c   : > { %1081 = dma.vmem_to_hbm [thread:$0]  (%p1984_p1), %s1822_s2, 128, %s1820_s18, %s752_s17   ;;  %v742_v31 = vsel %vm486_vm2, %v741_v29, 0.0  ;;  %v732_v32 = vadd.f32 %v731_v30, %v730_v28  ;;  %v729_v40 = vld [vmem:[%s1806_s9] sm:$0x1] }
 0x28d   : > { %v743_v33 = vrot.slane %v742_v31, 4  ;;  %s1009_s10 = sshll.u32 %s1468_s27, 4  ;;  %s787_s4 = sshll.u32 %s1806_s9, 4  ;;  %v740_v43 = vld [vmem:[%s1811_s21] sm:$0x1]  ;;  %s1859_s4 = int_to_ptr.vmem [resolvable:$true] %s787_s4 }
 0x28e   : > { %v733_v34 = vrot.slane %v732_v32, 2  ;;  %s800_s2 = sshll.u32 %s1811_s21, 4  ;;  %s1857_s13 = scalar_lea.hbm %s1951_s6, %s1009_s10  ;;  %s1868_s2 = int_to_ptr.vmem [resolvable:$true] %s800_s2 }
 0x28f   : > { %v744_v35 = vadd.f32 %v743_v33, %v742_v31  ;;  %s1985_s3 = sld [smem:[#allocation27_spill]]  ;;  %s1872_s23 = scalar_lea.sflag [#allocation14], %s345_s11 }
 0x290   : > { %v734_v36 = vadd.f32 %v733_v34, %v732_v32  ;;  %s1350_s20 = scalar_lea.vmem %s1859_s4, 16  ;;  %s1489_s16 = smov [#allocation13]  }
 0x291   : > { %v745_v37 = vrot.slane %v744_v35, 2  ;;  %p1351_p2 = scmp.ne.s32.totalorder %s1859_s4, %s1350_s20  ;;  %s1354_s12 = sshll.u32 %s1489_s16, 4  ;;  %s1355_s12 = int_to_ptr.vmem [resolvable:$false] %s1354_s12 }
 0x292   : > { %v735_v38 = vrot.slane %v734_v36, 1  ;;  %p1357_p5 = scmp.lt.s32.totalorder %s1859_s4, %s1355_s12 }
 0x293   : > { %v746_v39 = vadd.f32 %v745_v37, %v744_v35  ;;  %p1352_p13 = pnand %p1351_p2, %p1984_p1 }
 0x294   : > { %v736_v41 = vadd.f32 %v735_v38, %v734_v36 }
 0x295   : > { %v747_v42 = vrot.slane %v746_v39, 1  ;;  %s1866_s19 = scalar_lea.hbm %s1985_s3, %s1009_s10  ;;  %p1353_p3 = pneg %p1352_p13 }
 0x296   : > { %v737_v45 = vadd.f32 %v736_v41, %v729_v40 }
 0x297   : > { %v748_v44 = vadd.f32 %v747_v42, %v746_v39 }
 0x298   : > { %739 = vst.msk [vmem:[%s1806_s9] sm:$0x1] %vm562_vm3, %v737_v45  ;;  %s1356_s9 = scalar_lea.vmem %s1355_s12, 32 }
 0x299   : > { %v749_v46 = vadd.f32 %v748_v44, %v740_v43  ;;  %p1358_p6 = scmp.lt.s32.totalorder %s1356_s9, %s1350_s20 }
 0x29b   : > { %p1359_p10 = por %p1358_p6, %p1357_p5 }
 0x29d   : > { %p1360_p7 = pnand %p1359_p10, %p1353_p3 }
 0x29f   : > { %1363 = shalt.err (!%p1360_p7)
}
 0x2a0   : > { %s1364_s30 = scalar_lea.hbm %s1857_s13, 16  ;;  %s1368_s24 = scalar_lea.hbm %s1951_s6, 32 }
 0x2a1   : > { %p1365_p12 = scmp.ne.s32.totalorder %s1857_s13, %s1364_s30  ;;  %p1369_p0 = scmp.lt.u32.totalorder %s1857_s13, %s1951_s6 }
 0x2a2   : > { %p1370_p4 = scmp.lt.u32.totalorder %s1368_s24, %s1364_s30  ;;  %p1372_p2 = scmp.lt.u32.totalorder %s1364_s30, %s1857_s13 }
 0x2a3   : > { %p1366_p11 = pnand %p1365_p12, %p1984_p1 }
 0x2a4   : > { %p1371_p8 = por %p1370_p4, %p1369_p0 }
 0x2a5   : > { %p1367_p9 = pneg %p1366_p11 }
 0x2a6   : > { %p1373_p13 = por %p1372_p2, %p1371_p8 }
 0x2a8   : > { %p1374_p3 = pnand %p1373_p13, %p1367_p9 }
 0x2aa   : > { %1377 = shalt.err (!%p1374_p3)
}
 0x2ab   : > { %1082 = dma.vmem_to_hbm [thread:$0]  (%p1984_p1), %s1859_s4, 16, %s1857_s13, %s1872_s23   ;;  %750 = vst.msk [vmem:[%s1811_s21] sm:$0x1] %vm562_vm3, %v749_v46 }
 0x2ac   : > { %s1378_s17 = scalar_lea.vmem %s1868_s2, 16  ;;  %s1490_s27 = smov [#allocation15]  }
 0x2ad   : > { %p1379_p5 = scmp.ne.s32.totalorder %s1868_s2, %s1378_s17  ;;  %s1382_s8 = sshll.u32 %s1490_s27, 4  ;;  %s1383_s8 = int_to_ptr.vmem [resolvable:$false] %s1382_s8 }
 0x2ae   : > { %s1384_s20 = scalar_lea.vmem %s1383_s8, 32  ;;  %p1385_p7 = scmp.lt.s32.totalorder %s1868_s2, %s1383_s8 }
 0x2af   : > { %p1380_p6 = pnand %p1379_p5, %p1984_p1  ;;  %p1386_p12 = scmp.lt.s32.totalorder %s1384_s20, %s1378_s17 }
 0x2b1   : > { %p1381_p10 = pneg %p1380_p6  ;;  %p1387_p11 = por %p1386_p12, %p1385_p7 }
 0x2b3   : > { %p1388_p9 = pnand %p1387_p11, %p1381_p10 }
 0x2b5   : > { %1391 = shalt.err (!%p1388_p9)
}
 0x2b6   : > { %s1392_s21 = scalar_lea.hbm %s1866_s19, 16  ;;  %s1396_s16 = scalar_lea.hbm %s1985_s3, 32 }
 0x2b7   : > { %p1393_p0 = scmp.ne.s32.totalorder %s1866_s19, %s1392_s21  ;;  %p1397_p2 = scmp.lt.u32.totalorder %s1866_s19, %s1985_s3 }
 0x2b8   : > { %p1398_p13 = scmp.lt.u32.totalorder %s1396_s16, %s1392_s21  ;;  %p1400_p5 = scmp.lt.u32.totalorder %s1392_s21, %s1866_s19 }
 0x2b9   : > { %p1394_p4 = pnand %p1393_p0, %p1984_p1 }
 0x2ba   : > { %p1399_p3 = por %p1398_p13, %p1397_p2 }
 0x2bb   : > { %p1395_p8 = pneg %p1394_p4 }
 0x2bc   : > { %p1401_p6 = por %p1400_p5, %p1399_p3 }
 0x2be   : > { %p1402_p10 = pnand %p1401_p6, %p1395_p8 }
 0x2c0   : > { %1405 = shalt.err (!%p1402_p10)
}
 0x2c1   : > { %1083 = dma.vmem_to_hbm [thread:$0]  (%p1984_p1), %s1868_s2, 16, %s1866_s19, %s1872_s23  }
 0x2c2 PF: > { %s1986_s30 = sld [smem:[#allocation22_spill]]  ;;  %s1987_s11 = sld [smem:[#allocation23_spill]] }
 0x2c3   : > { %p1989_p12 = scmp.ge.s32.totalorder %s1476_s29, 2 }
 0x2c8   : > { %s812_s15 = sand.u32 1, %s1986_s30   ;;  %p1988_p7 = scmp.ne.s32.totalorder %s1987_s11, 0 }
 0x2c9   : > { %s813_s24 = scalar_lea.sflag [#allocation5], %s812_s15 }
 0x2ca   : > { %p1105_p11 = pnand %p1989_p12, %p1988_p7 }
 0x2cc   : > { %1447 = dma.done.wait (!%p1105_p11), %s813_s24, 128  }
 0x2cd   : > { %1449 = vsyncadd (!%p1105_p11), %s813_s24, 4294967168  ;;  %s1990_s10 = sadd.s32 4294967294, %s1476_s29  }
 0x2ce   : > { %s821_s18 = sand.u32 1, %s1990_s10  }
 0x2cf   : > { %s822_s17 = scalar_lea.sflag [#allocation14], %s821_s18 }
 0x2d0   : > { %1451 = dma.done.wait (!%p1105_p11), %s822_s17, 32  }
 0x2d1   : > { %1453 = vsyncadd (!%p1105_p11), %s822_s17, 4294967264  ;;  %s31_s29 = sadd.s32 1, %s1476_s29   ;;  %s1991_s24 = smov %s1460_s25 }
 0x2d2   : > { %p28_p1 = scmp.ge.s32.totalorder %s31_s29, 4   ;;  %s1992_s25 = smov %s1464_s26 }
 0x2d3   : > { %s1993_s26 = smov %s1694_s22  ;;  %s1994_s27 = smov %s1472_s28 }
 0x2d4   : > { %s1995_s28 = smov %s1997_s7  ;;  %30 = sbr.rel (!%p28_p1) target bundleno = 16 (0x10), region = 147 }
 0x2db   :  { %834 = vsyncpa [#allocation4], 1 }
 0x2dc   :  { %836 = vsyncpa [#allocation4 + $0x1], 1 }
 0x2dd   :  { %837 = vsyncpa [#allocation7], 1 }
 0x2de   :  { %839 = vsyncpa [#allocation7 + $0x1], 1 }
 0x2df   :  { %840 = vsyncpa [#allocation10], 1 }
 0x2e0   :  { %841 = vsyncpa [#allocation5], 1 }
 0x2e1   :  { %843 = vsyncpa [#allocation5 + $0x1], 1 }
 0x2e2   :  { %844 = vsyncpa [#allocation14], 1 }
 0x2e3   :  { %846 = vsyncpa [#allocation14 + $0x1], 1 }

</bundles_post_ra>
